<compile_context>
chip_gen: v5e
topology: v5e:2x2
jax: 0.10.0
libtpu: 0.0.40
codegen_flags: <defaults>
</compile_context>

<pallas_src>
import functools

import jax
import jax.numpy as jnp
from jax.experimental import pallas as pl
from jax.experimental.pallas import tpu as pltpu


def mlp_kernel(x_ref, w1_ref, b1_ref, w2_ref, b2_ref, o_ref):
    # hidden = relu(x @ W1 + b1) -- MXU matmul with f32 accumulation.
    prec1 = (jax.lax.Precision.HIGHEST
             if jnp.dtype(x_ref.dtype) == jnp.dtype(jnp.float32) else None)
    h = jnp.dot(x_ref[...], w1_ref[...],
                preferred_element_type=jnp.float32, precision=prec1)
    h = jnp.maximum(h + b1_ref[...], 0.0)           # bias bcast + ReLU on VPU (f32)

    # out = hidden @ W2 + b2.  Cast hidden to W2's dtype so the MXU stays on
    # the low-precision operand path when bf16 operands are used (no-op f32).
    prec2 = (jax.lax.Precision.HIGHEST
             if jnp.dtype(w2_ref.dtype) == jnp.dtype(jnp.float32) else None)
    out = jnp.dot(h.astype(w2_ref.dtype), w2_ref[...],
                  preferred_element_type=jnp.float32, precision=prec2)
    o_ref[...] = (out + b2_ref[...]).astype(o_ref.dtype)


def _round_up(n, m):
    return ((n + m - 1) // m) * m


def _choose_tile_b(batch, requested, sublane, min_steps=2):
    """Pick a sublane-aligned batch tile that divides the minimally padded batch.

    - Only the <= sublane-1 remainder of the batch is ever padded (no full
      extra HBM copy of x for awkward batch sizes).
    - tile is always a multiple of `sublane` (8 f32 / 16 bf16), so the
      BlockSpec (8,128) rule can never be violated by a user-supplied tile_b.
    - When the batch is big enough, prefer >= min_steps grid steps so the
      "parallel" batch axis actually shards across v7x's two TensorCores.
    """
    b_pad = _round_up(max(batch, 1), sublane)
    tile = max(sublane, (min(requested, b_pad) // sublane) * sublane)
    while b_pad % tile:                       # largest aligned divisor <= tile
        tile -= sublane
    if b_pad // tile < min_steps and b_pad >= min_steps * sublane:
        tile = max(sublane, ((b_pad // min_steps) // sublane) * sublane)
        while b_pad % tile:
            tile -= sublane
    return tile, b_pad


@functools.partial(jax.jit, static_argnames=("tile_b", "compute_dtype"))
def qnetwork_forward(x, w1, b1, w2, b2, *, tile_b=512, compute_dtype=None):
    """Forward pass of the Q-network MLP.

    x:  [B, in]          w1: [in, hidden]   b1: [1, hidden]
    w2: [hidden, out]    b2: [1, out]
    compute_dtype: optional low-precision operand dtype (e.g. jnp.bfloat16) for
        the MXU on any generation (v5e/v6e/v7x); accumulation stays f32.
    """
    B, in_size = x.shape
    hidden = w1.shape[1]
    out_size = w2.shape[1]
    out_dtype = x.dtype

    # Optional low-precision MXU operands (f32 accumulate inside the kernel).
    if compute_dtype is not None:
        x = x.astype(compute_dtype)
        w1 = w1.astype(compute_dtype)
        w2 = w2.astype(compute_dtype)
    # Biases are added to the f32 accumulator -> keep them f32.
    b1 = b1.astype(jnp.float32)
    b2 = b2.astype(jnp.float32)

    # Lane-dense hidden dimension: zero-pad to a multiple of 128 (exact math;
    # relu(0)=0 and zero W2 rows contribute nothing).  ~64 KB extra VMEM.
    hidden_pad = max(128, _round_up(hidden, 128))
    if hidden_pad != hidden:
        w1 = jnp.pad(w1, ((0, 0), (0, hidden_pad - hidden)))
        b1 = jnp.pad(b1, ((0, 0), (0, hidden_pad - hidden)))
        w2 = jnp.pad(w2, ((0, hidden_pad - hidden), (0, 0)))

    # Batch tiling: sublane-aligned tile that divides the minimally padded
    # batch; only a <= sublane-1 row remainder ever gets padded.
    eff_dtype = jnp.dtype(x.dtype)
    sublane = max(8, 32 // eff_dtype.itemsize)      # 8 f32, 16 bf16
    tile_b, b_pad = _choose_tile_b(B, tile_b, sublane)
    if b_pad != B:
        x = jnp.pad(x, ((0, b_pad - B), (0, 0)))

    grid = (b_pad // tile_b,)

    itemsize = lambda a: jnp.dtype(a.dtype).itemsize
    flops = 2 * b_pad * (in_size * hidden_pad + hidden_pad * out_size)
    bytes_accessed = (x.size * itemsize(x) + w1.size * itemsize(w1)
                      + b1.size * itemsize(b1) + w2.size * itemsize(w2)
                      + b2.size * itemsize(b2)
                      + b_pad * out_size * jnp.dtype(out_dtype).itemsize)

    out = pl.pallas_call(
        mlp_kernel,
        out_shape=jax.ShapeDtypeStruct((b_pad, out_size), out_dtype),
        grid_spec=pltpu.PrefetchScalarGridSpec(
            num_scalar_prefetch=0,
            grid=grid,
            in_specs=[
                pl.BlockSpec((tile_b, in_size), lambda i: (i, 0)),      # x: batch-tiled
                pl.BlockSpec((in_size, hidden_pad), lambda i: (0, 0)),  # w1: resident
                pl.BlockSpec((1, hidden_pad), lambda i: (0, 0)),        # b1: resident
                pl.BlockSpec((hidden_pad, out_size), lambda i: (0, 0)), # w2: resident
                pl.BlockSpec((1, out_size), lambda i: (0, 0)),          # b2: resident
            ],
            # True-width output block: contiguous HBM writeback of only
            # out_size lanes (no 128-lane zero padding, no post-call slice of
            # padded columns).
            out_specs=pl.BlockSpec((tile_b, out_size), lambda i: (i, 0)),
        ),
        compiler_params=pltpu.CompilerParams(
            dimension_semantics=("parallel",),   # batch tiles shard across TCs (v7x)
        ),
        cost_estimate=pl.CostEstimate(
            flops=flops, transcendentals=0, bytes_accessed=bytes_accessed),
    )(x, w1, b1, w2, b2)

    # Strip the (at most sublane-1 row) batch padding.
    return out[:B] if b_pad != B else out


def init_qnetwork_params(key, input_size, hidden_size, out_size, dtype=jnp.float32):
    """Deterministic init mimicking PyTorch nn.Linear: U(-1/sqrt(fan_in), 1/sqrt(fan_in))."""
    k1, k2, k3, k4 = jax.random.split(key, 4)
    bound1 = 1.0 / (input_size ** 0.5)
    bound2 = 1.0 / (hidden_size ** 0.5)
    w1 = jax.random.uniform(k1, (input_size, hidden_size), dtype, -bound1, bound1)
    b1 = jax.random.uniform(k2, (1, hidden_size), dtype, -bound1, bound1)
    w2 = jax.random.uniform(k3, (hidden_size, out_size), dtype, -bound2, bound2)
    b2 = jax.random.uniform(k4, (1, out_size), dtype, -bound2, bound2)
    return w1, b1, w2, b2


if __name__ == "__main__":
    # Small shapes consistent with a maze Q-network: state vec -> hidden -> 4 actions.
    # Batch of 64 exercises a 2-step batch grid (tile chooser splits for v7x).
    batch, input_size, hidden_size, out_size = 64, 16, 32, 4

    key = jax.random.PRNGKey(0)
    kx, kp = jax.random.split(key)
    x = jax.random.normal(kx, (batch, input_size), dtype=jnp.float32)
    w1, b1, w2, b2 = init_qnetwork_params(kp, input_size, hidden_size, out_size)

    # Pure-JAX reference (same semantics as the PyTorch forward), computed at
    # highest matmul precision so the f32 kernel path can be checked tightly.
    hp = jax.lax.Precision.HIGHEST
    ref = jnp.dot(jnp.maximum(jnp.dot(x, w1, precision=hp) + b1, 0.0),
                  w2, precision=hp) + b2

    # f32 operand path (Precision.HIGHEST inside the kernel).
    out = qnetwork_forward(x, w1, b1, w2, b2)
    out = jax.block_until_ready(out)
    assert out.shape == (batch, out_size)
    assert jnp.allclose(out, ref, atol=1e-4, rtol=1e-4)

    # bf16 operand path (valid on v5e/v6e/v7x; f32 accumulation): loose tolerance.
    out_bf16 = qnetwork_forward(x, w1, b1, w2, b2, compute_dtype=jnp.bfloat16)
    out_bf16 = jax.block_until_ready(out_bf16)
    assert out_bf16.shape == (batch, out_size)
    assert jnp.allclose(out_bf16, ref, atol=1e-1, rtol=1e-1)

    print("KERNEL_OK")
</pallas_src>

<mosaic_0001>
module attributes {stable_mosaic.version = 11 : i64} {
  func.func @mlp_kernel(%arg0: i32, %arg1: memref<32x16xf32, #tpu.memory_space<vmem>>, %arg2: memref<16x128xf32, #tpu.memory_space<vmem>>, %arg3: memref<1x128xf32, #tpu.memory_space<vmem>>, %arg4: memref<128x4xf32, #tpu.memory_space<vmem>>, %arg5: memref<1x4xf32, #tpu.memory_space<vmem>>, %arg6: memref<32x4xf32, #tpu.memory_space<vmem>>) attributes {dimension_semantics = [#tpu.dimension_semantics<parallel>], iteration_bounds = array<i64: 2>, scalar_prefetch = 0 : i64, scratch_operands = 0 : i64, tpu.core_type = #tpu.core_type<tc>, window_params = [{transform_indices = @transform_0, window_bounds = array<i64: 32, 16>}, {pipeline_mode = #tpu.pipeline_mode<synchronous>, transform_indices = @transform_1, window_bounds = array<i64: 16, 128>}, {pipeline_mode = #tpu.pipeline_mode<synchronous>, transform_indices = @transform_2, window_bounds = array<i64: 1, 128>}, {pipeline_mode = #tpu.pipeline_mode<synchronous>, transform_indices = @transform_3, window_bounds = array<i64: 128, 4>}, {pipeline_mode = #tpu.pipeline_mode<synchronous>, transform_indices = @transform_4, window_bounds = array<i64: 1, 4>}, {transform_indices = @transform_5, window_bounds = array<i64: 32, 4>}]} {
    %c0 = arith.constant 0 : index
    %c0_0 = arith.constant 0 : index
    %0 = vector.load %arg1[%c0, %c0_0] : memref<32x16xf32, #tpu.memory_space<vmem>>, vector<32x16xf32>
    %c0_1 = arith.constant 0 : index
    %c0_2 = arith.constant 0 : index
    %1 = vector.load %arg2[%c0_1, %c0_2] : memref<16x128xf32, #tpu.memory_space<vmem>>, vector<16x128xf32>
    %cst = arith.constant dense<0.000000e+00> : vector<32x128xf32>
    %2 = tpu.matmul %0, %1, %cst {dimension_numbers = #tpu.dot_dimension_numbers<[1], [0], [0], [1], [0, 0, 1, 1], [], []>, precision = #tpu.contract_precision<fp32>} : vector<32x16xf32>, vector<16x128xf32>, vector<32x128xf32> -> vector<32x128xf32>
    %c0_3 = arith.constant 0 : index
    %c0_4 = arith.constant 0 : index
    %3 = vector.load %arg3[%c0_3, %c0_4] : memref<1x128xf32, #tpu.memory_space<vmem>>, vector<1x128xf32>
    %4 = vector.broadcast %3 : vector<1x128xf32> to vector<32x128xf32>
    %5 = arith.addf %2, %4 : vector<32x128xf32>
    %cst_5 = arith.constant 0.000000e+00 : f32
    %6 = vector.broadcast %cst_5 : f32 to vector<32x128xf32>
    %7 = arith.maximumf %5, %6 : vector<32x128xf32>
    %c0_6 = arith.constant 0 : index
    %c0_7 = arith.constant 0 : index
    %8 = vector.load %arg4[%c0_6, %c0_7] : memref<128x4xf32, #tpu.memory_space<vmem>>, vector<128x4xf32>
    %cst_8 = arith.constant dense<0.000000e+00> : vector<32x4xf32>
    %9 = tpu.matmul %7, %8, %cst_8 {dimension_numbers = #tpu.dot_dimension_numbers<[1], [0], [0], [1], [0, 0, 1, 1], [], []>, precision = #tpu.contract_precision<fp32>} : vector<32x128xf32>, vector<128x4xf32>, vector<32x4xf32> -> vector<32x4xf32>
    %c0_9 = arith.constant 0 : index
    %c0_10 = arith.constant 0 : index
    %10 = vector.load %arg5[%c0_9, %c0_10] : memref<1x4xf32, #tpu.memory_space<vmem>>, vector<1x4xf32>
    %11 = vector.broadcast %10 : vector<1x4xf32> to vector<32x4xf32>
    %12 = arith.addf %9, %11 : vector<32x4xf32>
    %c0_11 = arith.constant 0 : index
    %c0_12 = arith.constant 0 : index
    %13 = vector.load %arg6[%c0_11, %c0_12] : memref<32x4xf32, #tpu.memory_space<vmem>>, vector<32x4xf32>
    tpu.vector_store %arg6[%c0_11, %c0_12], %12 {strides = array<i32>} : memref<32x4xf32, #tpu.memory_space<vmem>>, vector<32x4xf32>,
    return
  }
  func.func @transform_0(%arg0: i32) -> (i32, i32) {
    %c0_i32 = arith.constant 0 : i32
    %c0_i32_0 = arith.constant 0 : i32
    return %arg0, %c0_i32 : i32, i32
  }
  func.func @transform_1(%arg0: i32) -> (i32, i32) {
    %c0_i32 = arith.constant 0 : i32
    %c0_i32_0 = arith.constant 0 : i32
    %c0_i32_1 = arith.constant 0 : i32
    return %c0_i32, %c0_i32_0 : i32, i32
  }
  func.func @transform_2(%arg0: i32) -> (i32, i32) {
    %c0_i32 = arith.constant 0 : i32
    %c0_i32_0 = arith.constant 0 : i32
    %c0_i32_1 = arith.constant 0 : i32
    return %c0_i32, %c0_i32_0 : i32, i32
  }
  func.func @transform_3(%arg0: i32) -> (i32, i32) {
    %c0_i32 = arith.constant 0 : i32
    %c0_i32_0 = arith.constant 0 : i32
    %c0_i32_1 = arith.constant 0 : i32
    return %c0_i32, %c0_i32_0 : i32, i32
  }
  func.func @transform_4(%arg0: i32) -> (i32, i32) {
    %c0_i32 = arith.constant 0 : i32
    %c0_i32_0 = arith.constant 0 : i32
    %c0_i32_1 = arith.constant 0 : i32
    return %c0_i32, %c0_i32_0 : i32, i32
  }
  func.func @transform_5(%arg0: i32) -> (i32, i32) {
    %c0_i32 = arith.constant 0 : i32
    %c0_i32_0 = arith.constant 0 : i32
    return %arg0, %c0_i32 : i32, i32
  }
}

</mosaic_0001>

<bundles_post_ra>
// kernel: qnetwork_forward.1
= control target key start
LH: loop header
LB: loop body
LE: loop exit
PB: predicated region body
PF: predicated region fallthrough
CT: control target
= control target key end

     0   :  { %s1081_s18 = smov 0   ;;  %s1420_s0 = inlined_call_operand.vmem [shape: f32[64,16], index: 0, kind: input, shape index: {}]   ;;  %s1421_s1 = inlined_call_operand.vmem [shape: f32[16,128], index: 1, kind: input, shape index: {}]   ;;  %s1422_s2 = inlined_call_operand.vmem [shape: f32[1,128], index: 2, kind: input, shape index: {}]   ;;  %s1423_s3 = inlined_call_operand.vmem [shape: f32[128,4], index: 3, kind: input, shape index: {}]   ;;  %s1424_s4 = inlined_call_operand.vmem [shape: f32[1,4], index: 4, kind: input, shape index: {}]   ;;  %s1425_s5 = inlined_call_operand.vmem [shape: f32[64,4], index: 5, kind: output, shape index: {}]  }
   0x1 LB: > { %s1022_s19 = sadd.s32 4294967295, %s1049_s18   ;;  %p1026_p0 = scmp.ge.s32.totalorder %s1049_s18, 1  ;;  %s1049_s18 = sphi %s1081_s18, %s15_s18  }
   0x2   : > { %p188_p1 = scmp.lt.s32.totalorder %s1049_s18, 3 }
   0x4   : > { %p189_p2 = pnand %p1026_p0, %p188_p1 }
   0x5   : > { %s1027_s24 = sshll.u32 (!%p189_p2), %s1022_s19, 2 }
   0x6   : > { %192 = sbr.rel (%p189_p2) target bundleno = 393 (0x189), region = 40  ;;  %p217_p3 = scmp.lt.s32.totalorder (!%p189_p2), %s1027_s24, 7 }
   0xb   : > { %v233_v0 = vld [vmem:[%s1421_s1 + $0x8] sm:$0xff]  ;;  %v232_v1 = vld [vmem:[%s1421_s1] sm:$0xff]  ;;  %s1427_s24 = smov (!%p217_p3, %s1027_s24), 7  ;;  %vm238_vm0 = vcmask 130048   ;;  %v522_v40 = vld [vmem:[%s1423_s3 + $0x78] sm:$0xff]  ;;  %vm961_vm1 = vcmask 31744  }
   0xc   : > { %v265_v2 = vand.u32 4294901760, %v233_v0  ;;  %v267_v3 = vand.u32 4294901760, %v232_v1  ;;  %s1028_s25 = sshll.u32 %s1427_s24, 3  ;;  %v1116_v41 = vand.u32 4294901760, %v522_v40  ;;  %v521_v42 = vld [vmem:[%s1423_s3 + $0x70] sm:$0xff]  ;;  %v520_v45 = vld [vmem:[%s1423_s3 + $0x68] sm:$0xff] }
   0xd   : > { %s1103_s28 = scalar_lea.vmem %s1420_s0, %s1028_s25  ;;  %v1124_v44 = vand.u32 4294901760, %v521_v42  ;;  %v1136_v48 = vand.u32 4294901760, %v520_v45  ;;  %v519_v49 = vld [vmem:[%s1423_s3 + $0x60] sm:$0xff]  ;;  %v518_v54 = vld [vmem:[%s1423_s3 + $0x58] sm:$0xff]  ;;  %v517_v60 = vld [vmem:[%s1423_s3 + $0x50] sm:$0xff]  ;;  %s1407_s21 = scalar_lea.vmem %s1425_s5, %s1028_s25 }
   0xe   : > { %v317_v4 = vsub.f32 %v233_v0, %v265_v2  ;;  %266 = vmatpush.msra.mxu0 %v265_v2  ;;  %v323_v5 = vsub.f32 %v232_v1, %v267_v3  ;;  %401 = vmatpush.msra.mxu3 %v265_v2  ;;  %v228_v8 = vld [vmem:[%s1103_s28] sm:$0xff]  ;;  %v229_v11 = vld [vmem:[%s1103_s28 + $0x8] sm:$0xff]  ;;  %v230_v18 = vld [vmem:[%s1103_s28 + $0x10] sm:$0xff]  ;;  %v1122_v43 = vsub.f32 %v522_v40, %v1116_v41  ;;  %v1151_v53 = vand.u32 4294901760, %v519_v49 }
   0xf   : > { %v240_v12 = vsel %vm238_vm0, %v228_v8, 0  ;;  %v243_v13 = vsel %vm238_vm0, %v229_v11, 0  ;;  %v246_v21 = vsel %vm238_vm0, %v230_v18, 0  ;;  %v231_v27 = vld [vmem:[%s1103_s28 + $0x18] sm:$0xff]  ;;  %v1133_v47 = vsub.f32 %v521_v42, %v1124_v44  ;;  %v515_v8 = vld [vmem:[%s1423_s3 + $0x40] sm:$0xff] }
  0x10   : > { %361 = vmatpush.msra.mxu2 %v317_v4  ;;  %268 = vmatpush.msra.mxu0 %v267_v3  ;;  %v318_v6 = vand.u32 4294901760, %v317_v4  ;;  %v324_v7 = vand.u32 4294901760, %v323_v5  ;;  %v269_v14 = vand.u32 4294901760, %v240_v12  ;;  %v277_v17 = vand.u32 4294901760, %v243_v13 }
  0x11   : > { %403 = vmatpush.msra.mxu3 %v267_v3  ;;  %v285_v25 = vand.u32 4294901760, %v246_v21  ;;  %v249_v30 = vsel %vm238_vm0, %v231_v27, 0  ;;  %v594_v46 = vand.u32 4294901760, %v1122_v43  ;;  %v600_v51 = vand.u32 4294901760, %v1133_v47 }
  0x12   : > { %364 = vmatpush.msra.mxu2 %v323_v5  ;;  %v319_v9 = vsub.f32 %v317_v4, %v318_v6  ;;  %446 = vmatpush.msrb.mxu0 %v318_v6  ;;  %v325_v10 = vsub.f32 %v323_v5, %v324_v7  ;;  %v270_v19 = vsub.f32 %v240_v12, %v269_v14  ;;  %v293_v33 = vand.u32 4294901760, %v249_v30 }
  0x13   : > { %v278_v20 = vsub.f32 %v243_v13, %v277_v17  ;;  %v286_v29 = vsub.f32 %v246_v21, %v285_v25  ;;  %v595_v50 = vsub.f32 %v1122_v43, %v594_v46  ;;  %v1148_v52 = vsub.f32 %v520_v45, %v1136_v48 }
  0x14   : > { %v320_v15 = vand.u32 4294901760, %v319_v9  ;;  %v326_v16 = vand.u32 4294901760, %v325_v10  ;;  %450 = vmatpush.msrb.mxu0 %v324_v7  ;;  %367 = vmatmul.f32.vlgmr.msra.gmra.mxu2 %v270_v19  ;;  %v271_v22 = vand.u32 4294901760, %v270_v19  ;;  %v294_v35 = vsub.f32 %v249_v30, %v293_v33 }
  0x15   : > { %v279_v24 = vand.u32 4294901760, %v278_v20  ;;  %v287_v32 = vand.u32 4294901760, %v286_v29  ;;  %528 = vmatpush.msrb.mxu2 %v1116_v41  ;;  %v596_v55 = vand.u32 4294901760, %v595_v50  ;;  %v601_v56 = vsub.f32 %v1133_v47, %v600_v51  ;;  %v509_v50 = vld [vmem:[%s1423_s3 + $0x10] sm:$0xff] }
  0x16   : > { %321 = vmatpush.msra.mxu1 %v320_v15  ;;  %v272_v23 = vsub.f32 %v270_v19, %v271_v22  ;;  %407 = vmatmul.f32.vlgmr.msra.gmra.mxu3 %v271_v22  ;;  %v295_v37 = vand.u32 4294901760, %v294_v35  ;;  %v606_v57 = vand.u32 4294901760, %v1148_v52  ;;  %v1163_v58 = vsub.f32 %v519_v49, %v1151_v53 }
  0x17   : > { %v280_v28 = vsub.f32 %v278_v20, %v279_v24  ;;  %v288_v34 = vsub.f32 %v286_v29, %v287_v32  ;;  %530 = vmatpush.msrb.mxu2 %v1124_v44  ;;  %v1167_v59 = vand.u32 4294901760, %v518_v54  ;;  %597 = vmatpush.msrb.mxu3 %v596_v55  ;;  %v602_v61 = vand.u32 4294901760, %v601_v56 }
  0x18   : > { %327 = vmatpush.msra.mxu1 %v326_v16  ;;  %v273_v26 = vand.u32 4294901760, %v272_v23  ;;  %v296_v38 = vsub.f32 %v294_v35, %v295_v37  ;;  %v607_v62 = vsub.f32 %v1148_v52, %v606_v57  ;;  %v612_v63 = vand.u32 4294901760, %v1163_v58 }
  0x19   : > { %329 = vmatmul.f32.vlgmr.msra.gmra.mxu1 %v269_v14  ;;  %v281_v31 = vand.u32 4294901760, %v280_v28  ;;  %v289_v36 = vand.u32 4294901760, %v288_v34  ;;  %532 = vmatpush.msrb.mxu2 %v1136_v48  ;;  %v1178_v0 = vand.u32 4294901760, %v517_v60  ;;  %v1181_v1 = vsub.f32 %v518_v54, %v1167_v59 }
  0x1a   : > { %483 = vmatpush.msrb.mxu1 %v265_v2  ;;  %274 = vmatmul.f32.vlgmr.msra.gmra.mxu0 %v273_v26  ;;  %v297_v39 = vand.u32 4294901760, %v296_v38  ;;  %v516_v2 = vld [vmem:[%s1423_s3 + $0x48] sm:$0xff]  ;;  %v613_v4 = vsub.f32 %v1163_v58, %v612_v63  ;;  %v1206_v12 = vand.u32 4294901760, %v515_v8  ;;  %v510_v38 = vld [vmem:[%s1423_s3 + $0x18] sm:$0xff] }
  0x1b   : > { %707 = vmatpush.msra.mxu0 %v1122_v43  ;;  %534 = vmatpush.msrb.mxu2 %v1151_v53  ;;  %v1192_v5 = vsub.f32 %v517_v60, %v1178_v0  ;;  %v1194_v6 = vand.u32 4294901760, %v516_v2  ;;  %v618_v7 = vand.u32 4294901760, %v1181_v1  ;;  %v512_v26 = vld [vmem:[%s1423_s3 + $0x28] sm:$0xff]  ;;  %v1280_v45 = vand.u32 4294901760, %v510_v38  ;;  %v1041_v43 = vld [vmem:[%s1422_s2] ss:$0 sm:$0xff] }
  0x1c   : > { %485 = vmatpush.msrb.mxu1 %v267_v3  ;;  %372 = vmatmul.f32.gmra.mxu2 %v278_v20  ;;  %v608_v3 = vand.u32 4294901760, %v607_v62  ;;  %v614_v9 = vand.u32 4294901760, %v613_v4  ;;  %v513_v20 = vld [vmem:[%s1423_s3 + $0x30] sm:$0xff]  ;;  %v1250_v30 = vand.u32 4294901760, %v512_v26  ;;  %v1298_v60 = vand.u32 4294901760, %v509_v50 }
  0x1d   : > { %710 = vmatpush.msra.mxu0 %v1133_v47  ;;  %536 = vmatpush.msrb.mxu2 %v1167_v59  ;;  %v624_v10 = vand.u32 4294901760, %v1192_v5  ;;  %v1204_v11 = vsub.f32 %v516_v2, %v1194_v6  ;;  %v619_v13 = vsub.f32 %v1181_v1, %v618_v7  ;;  %v1296_v56 = vsub.f32 %v510_v38, %v1280_v45  ;;  %v508_v2 = vld [vmem:[%s1423_s3 + $0x8] sm:$0xff] }
  0x1e   : > { %413 = vmatmul.f32.gmra.mxu3 %v279_v24  ;;  %775 = vmatpush.msra.mxu1 %v1116_v41 }
  0x1f   : > { %713 = vmatpush.msra.mxu0 %v1148_v52  ;;  %603 = vmatpush.msrb.mxu3 %v602_v61  ;;  %v625_v15 = vsub.f32 %v1192_v5, %v624_v10  ;;  %v630_v16 = vand.u32 4294901760, %v1204_v11  ;;  %v620_v19 = vand.u32 4294901760, %v619_v13  ;;  %v1318_v13 = vand.u32 4294901760, %v508_v2 }
  0x20   : > { %777 = vmatpush.msra.mxu1 %v1124_v44  ;;  %538 = vmatpush.msrb.mxu2 %v1178_v0 }
  0x21   : > { %333 = vmatmul.f32.gmra.mxu1 %v277_v17  ;;  %716 = vmatpush.msra.mxu0 %v1163_v58  ;;  %v626_v21 = vand.u32 4294901760, %v625_v15  ;;  %v631_v22 = vsub.f32 %v1204_v11, %v630_v16 }
  0x22   : > { %282 = vmatmul.f32.gmra.mxu0 %v281_v31  ;;  %779 = vmatpush.msra.mxu1 %v1136_v48 }
  0x23   : > { %719 = vmatpush.msra.mxu0 %v1181_v1  ;;  %609 = vmatpush.msrb.mxu3 %v608_v3  ;;  %v632_v27 = vand.u32 4294901760, %v631_v22  ;;  %v1332_v22 = vsub.f32 %v508_v2, %v1318_v13 }
  0x24   : > { %377 = vmatmul.f32.gmra.mxu2 %v286_v29  ;;  %781 = vmatpush.msra.mxu1 %v1151_v53 }
  0x25   : > { %722 = vmatpush.msra.mxu0 %v1192_v5  ;;  %615 = vmatpush.msrb.mxu3 %v614_v9  ;;  %v1313_v9 = vsub.f32 %v509_v50, %v1298_v60 }
  0x26   : > { %419 = vmatmul.f32.gmra.mxu3 %v287_v32  ;;  %783 = vmatpush.msra.mxu1 %v1167_v59  ;;  %v511_v32 = vld [vmem:[%s1423_s3 + $0x20] sm:$0xff] }
  0x27   : > { %540 = vmatpush.msrb.mxu2 %v1194_v6  ;;  %725 = vmatpush.msra.mxu0 %v1204_v11 }
  0x28   : > { %785 = vmatpush.msra.mxu1 %v1178_v0  ;;  %621 = vmatpush.msrb.mxu3 %v620_v19 }
  0x29   : > { %337 = vmatmul.f32.gmra.mxu1 %v285_v25  ;;  %542 = vmatpush.msrb.mxu2 %v1206_v12 }
  0x2a   : > { %290 = vmatmul.f32.gmra.mxu0 %v289_v36  ;;  %787 = vmatpush.msra.mxu1 %v1194_v6  ;;  %v1267_v36 = vand.u32 4294901760, %v511_v32 }
  0x2b   : > { %627 = vmatpush.msrb.mxu3 %v626_v21 }
  0x2c   : > { %382 = vmatmul.f32.gmra.mxu2 %v294_v35  ;;  %789 = vmatpush.msra.mxu1 %v1206_v12  ;;  %v1265_v35 = vsub.f32 %v512_v26, %v1250_v30  ;;  %v1278_v42 = vsub.f32 %v511_v32, %v1267_v36 }
  0x2d   : > { %633 = vmatpush.msrb.mxu3 %v632_v27 }
  0x2e   : > { %425 = vmatmul.f32.gmra.mxu3 %v295_v37  ;;  %v654_v40 = vand.u32 4294901760, %v1265_v35  ;;  %v660_v55 = vand.u32 4294901760, %v1278_v42 }
  0x30   : > { %v655_v54 = vsub.f32 %v1265_v35, %v654_v40  ;;  %v661_v4 = vsub.f32 %v1278_v42, %v660_v55 }
  0x31   : > { %341 = vmatmul.f32.gmra.mxu1 %v293_v33 }
  0x32   : > { %298 = vmatmul.f32.gmra.mxu0 %v297_v39  ;;  %v656_v3 = vand.u32 4294901760, %v655_v54  ;;  %v662_v15 = vand.u32 4294901760, %v661_v4 }
  0x39   : > { %487 = vmatmul.f32.vlgmr.msrb.gmra.mxu1 %v269_v14 }
  0x3a   : > { %452 = vmatmul.f32.vlgmr.msrb.gmra.mxu0 %v269_v14  ;;  %v514_v14 = vld [vmem:[%s1423_s3 + $0x38] sm:$0xff] }
  0x3b   : > { %v1224_v18 = vand.u32 4294901760, %v514_v14 }
  0x3d   : > { %v1237_v24 = vsub.f32 %v514_v14, %v1224_v18  ;;  %791 = vmatpush.msra.mxu1 %v1224_v18  ;;  %544 = vmatpush.msrb.mxu2 %v1224_v18  ;;  %v507_v14 = vld [vmem:[%s1423_s3] sm:$0xff] }
  0x3e   : > { %v1327_v21 = vand.u32 4294901760, %v507_v14 }
  0x3f   : > { %v642_v29 = vand.u32 4294901760, %v1237_v24 }
  0x40   : > { %v1339_v32 = vsub.f32 %v507_v14, %v1327_v21 }
  0x41   : > { %491 = vmatmul.f32.gmra.mxu1 %v277_v17  ;;  %v643_v34 = vsub.f32 %v1237_v24, %v642_v29 }
  0x42   : > { %456 = vmatmul.f32.gmra.mxu0 %v277_v17  ;;  %v1222_v17 = vsub.f32 %v515_v8, %v1206_v12  ;;  %v666_v8 = vand.u32 4294901760, %v1296_v56  ;;  %v684_v38 = vand.u32 4294901760, %v1339_v32 }
  0x43   : > { %v644_v39 = vand.u32 4294901760, %v643_v34 }
  0x44   : > { %v636_v23 = vand.u32 4294901760, %v1222_v17  ;;  %728 = vmatpush.msra.mxu0 %v1222_v17  ;;  %v667_v19 = vsub.f32 %v1296_v56, %v666_v8  ;;  %v685_v50 = vsub.f32 %v1339_v32, %v684_v38 }
  0x46   : > { %v637_v28 = vsub.f32 %v1222_v17, %v636_v23  ;;  %731 = vmatpush.msra.mxu0 %v1237_v24  ;;  %v668_v27 = vand.u32 4294901760, %v667_v19 }
  0x49   : > { %495 = vmatmul.f32.gmra.mxu1 %v285_v25 }
  0x4a   : > { %460 = vmatmul.f32.gmra.mxu0 %v285_v25  ;;  %v1241_v25 = vand.u32 4294901760, %v513_v20 }
  0x4c   : > { %v1255_v31 = vsub.f32 %v513_v20, %v1241_v25  ;;  %793 = vmatpush.msra.mxu1 %v1241_v25  ;;  %546 = vmatpush.msrb.mxu2 %v1241_v25  ;;  %v672_v20 = vand.u32 4294901760, %v1313_v9 }
  0x4e   : > { %v648_v37 = vand.u32 4294901760, %v1255_v31  ;;  %734 = vmatpush.msra.mxu0 %v1255_v31  ;;  %795 = vmatpush.msra.mxu1 %v1250_v30 }
  0x4f   : > { %548 = vmatpush.msrb.mxu2 %v1250_v30 }
  0x50   : > { %v649_v49 = vsub.f32 %v1255_v31, %v648_v37  ;;  %737 = vmatpush.msra.mxu0 %v1265_v35  ;;  %797 = vmatpush.msra.mxu1 %v1267_v36 }
  0x51   : > { %499 = vmatmul.f32.gmra.mxu1 %v293_v33  ;;  %550 = vmatpush.msrb.mxu2 %v1267_v36 }
  0x52   : > { %464 = vmatmul.f32.gmra.mxu0 %v293_v33  ;;  %v638_v33 = vand.u32 4294901760, %v637_v28  ;;  %v650_v62 = vand.u32 4294901760, %v649_v49  ;;  %799 = vmatpush.msra.mxu1 %v1280_v45  ;;  %v673_v28 = vsub.f32 %v1313_v9, %v672_v20 }
  0x53   : > { %740 = vmatpush.msra.mxu0 %v1278_v42  ;;  %552 = vmatpush.msrb.mxu2 %v1280_v45 }
  0x54   : > { %639 = vmatpush.msrb.mxu3 %v638_v33  ;;  %801 = vmatpush.msra.mxu1 %v1298_v60  ;;  %v678_v33 = vand.u32 4294901760, %v1332_v22  ;;  %v674_v34 = vand.u32 4294901760, %v673_v28 }
  0x55   : > { %743 = vmatpush.msra.mxu0 %v1296_v56  ;;  %554 = vmatpush.msrb.mxu2 %v1298_v60 }
  0x56   : > { %645 = vmatpush.msrb.mxu3 %v644_v39  ;;  %803 = vmatpush.msra.mxu1 %v1318_v13  ;;  %v679_v49 = vsub.f32 %v1332_v22, %v678_v33 }
  0x57   : > { %746 = vmatpush.msra.mxu0 %v1313_v9  ;;  %556 = vmatpush.msrb.mxu2 %v1318_v13 }
  0x58   : > { %651 = vmatpush.msrb.mxu3 %v650_v62  ;;  %805 = vmatpush.msra.mxu1 %v1327_v21  ;;  %v680_v54 = vand.u32 4294901760, %v679_v49  ;;  %v686_v62 = vand.u32 4294901760, %v685_v50 }
  0x59   : > { %749 = vmatpush.msra.mxu0 %v1332_v22  ;;  %558 = vmatpush.msrb.mxu2 %v1327_v21 }
  0x5a   : > { %657 = vmatpush.msrb.mxu3 %v656_v3 }
  0x5b   : > { %752 = vmatpush.msra.mxu0 %v1339_v32  ;;  %834 = vmatpush.msra.mxu2 %v594_v46 }
  0x5c   : > { %663 = vmatpush.msrb.mxu3 %v662_v15 }
  0x5d   : > { %838 = vmatpush.msra.mxu2 %v600_v51 }
  0x5e   : > { %669 = vmatpush.msrb.mxu3 %v668_v27 }
  0x5f   : > { %842 = vmatpush.msra.mxu2 %v606_v57 }
  0x60   : > { %675 = vmatpush.msrb.mxu3 %v674_v34 }
  0x61   : > { %846 = vmatpush.msra.mxu2 %v612_v63 }
  0x62   : > { %681 = vmatpush.msrb.mxu3 %v680_v54 }
  0x63   : > { %850 = vmatpush.msra.mxu2 %v618_v7 }
  0x64   : > { %687 = vmatpush.msrb.mxu3 %v686_v62 }
  0x65   : > { %854 = vmatpush.msra.mxu2 %v624_v10 }
  0x66   : > { %913 = vmatpush.msra.mxu3 %v1116_v41 }
  0x67   : > { %858 = vmatpush.msra.mxu2 %v630_v16 }
  0x68   : > { %915 = vmatpush.msra.mxu3 %v1124_v44 }
  0x69   : > { %862 = vmatpush.msra.mxu2 %v636_v23 }
  0x6a   : > { %917 = vmatpush.msra.mxu3 %v1136_v48 }
  0x6b   : > { %866 = vmatpush.msra.mxu2 %v642_v29 }
  0x6c   : > { %919 = vmatpush.msra.mxu3 %v1151_v53 }
  0x6d   : > { %870 = vmatpush.msra.mxu2 %v648_v37 }
  0x6e   : > { %921 = vmatpush.msra.mxu3 %v1167_v59 }
  0x6f   : > { %874 = vmatpush.msra.mxu2 %v654_v40 }
  0x70   : > { %923 = vmatpush.msra.mxu3 %v1178_v0 }
  0x71   : > { %878 = vmatpush.msra.mxu2 %v660_v55 }
  0x72   : > { %925 = vmatpush.msra.mxu3 %v1194_v6 }
  0x73   : > { %882 = vmatpush.msra.mxu2 %v666_v8 }
  0x74   : > { %927 = vmatpush.msra.mxu3 %v1206_v12 }
  0x75   : > { %886 = vmatpush.msra.mxu2 %v672_v20 }
  0x76   : > { %929 = vmatpush.msra.mxu3 %v1224_v18 }
  0x77   : > { %890 = vmatpush.msra.mxu2 %v678_v33 }
  0x78   : > { %931 = vmatpush.msra.mxu3 %v1241_v25 }
  0x79   : > { %894 = vmatpush.msra.mxu2 %v684_v38 }
  0x7a   : > { %933 = vmatpush.msra.mxu3 %v1250_v30 }
  0x7c   : > { %935 = vmatpush.msra.mxu3 %v1267_v36 }
  0x7e   : > { %937 = vmatpush.msra.mxu3 %v1280_v45 }
  0x80   : > { %939 = vmatpush.msra.mxu3 %v1298_v60 }
  0x82   : > { %941 = vmatpush.msra.mxu3 %v1318_v13 }
  0x84   : > { %943 = vmatpush.msra.mxu3 %v1327_v21 }
  0x96   : > { %v1302_v61 = vpop.f32.mrf.mxu1 }
  0x97   : > { %v275_v26 = vpop.f32.mrf.mxu0  ;;  %v368_v41 = vpop.f32.mrf.mxu2 }
  0x98   : > { %v276_v44 = vadd.f32 %v1041_v43, %v275_v26 }
  0x99   : > { %v408_v48 = vpop.f32.mrf.mxu3 }
  0x9a   : > { %v331_v51 = vadd.f32 %v1302_v61, %v276_v44 }
  0x9c   : > { %v369_v53 = vadd.f32 %v368_v41, %v331_v51 }
  0x9e   : > { %v334_v39 = vpop.f32.mrf.mxu1  ;;  %v409_v63 = vadd.f32 %v408_v48, %v369_v53 }
  0x9f   : > { %v283_v2 = vpop.f32.mrf.mxu0  ;;  %v373_v59 = vpop.f32.mrf.mxu2 }
  0xa0   : > { %v284_v57 = vadd.f32 %v1041_v43, %v283_v2 }
  0xa1   : > { %v414_v1 = vpop.f32.mrf.mxu3 }
  0xa2   : > { %v335_v0 = vadd.f32 %v334_v39, %v284_v57  ;;  %v1042_v57 = vld [vmem:[%s1424_s4] ss:$0 sm:$0xff] }
  0xa4   : > { %v374_v7 = vadd.f32 %v373_v59, %v335_v0 }
  0xa6   : > { %v338_v3 = vpop.f32.mrf.mxu1  ;;  %v415_v18 = vadd.f32 %v414_v1, %v374_v7 }
  0xa7   : > { %v291_v46 = vpop.f32.mrf.mxu0  ;;  %v378_v17 = vpop.f32.mrf.mxu2 }
  0xa8   : > { %v292_v10 = vadd.f32 %v1041_v43, %v291_v46 }
  0xa9   : > { %v420_v31 = vpop.f32.mrf.mxu3 }
  0xaa   : > { %v339_v23 = vadd.f32 %v338_v3, %v292_v10 }
  0xac   : > { %v379_v35 = vadd.f32 %v378_v17, %v339_v23 }
  0xae   : > { %v342_v47 = vpop.f32.mrf.mxu1  ;;  %v421_v56 = vadd.f32 %v420_v31, %v379_v35 }
  0xaf   : > { %v299_v52 = vpop.f32.mrf.mxu0  ;;  %v383_v8 = vpop.f32.mrf.mxu2 }
  0xb0   : > { %v300_v36 = vadd.f32 %v1041_v43, %v299_v52 }
  0xb1   : > { %v426_v21 = vpop.f32.mrf.mxu3 }
  0xb2   : > { %v343_v60 = vadd.f32 %v342_v47, %v300_v36 }
  0xb4   : > { %v384_v15 = vadd.f32 %v383_v8, %v343_v60 }
  0xb6   : > { %v488_v58 = vpop.f32.mrf.mxu1  ;;  %v427_v27 = vadd.f32 %v426_v21, %v384_v15 }
  0xb7   : > { %v453_v5 = vpop.f32.mrf.mxu0 }
  0xb8   : > { %v454_v6 = vadd.f32 %v453_v5, %v409_v63 }
  0xba   : > { %v489_v11 = vadd.f32 %v488_v58, %v454_v6 }
  0xbc   : > { %v503_v16 = vmax.f32 %v489_v11, 0.0 }
  0xbe   : > { %v492_v12 = vpop.f32.mrf.mxu1  ;;  %v559_v24 = vand.u32 4294901760, %v503_v16 }
  0xbf   : > { %v457_v25 = vpop.f32.mrf.mxu0 }
  0xc0   : > { %v560_v29 = vsub.f32 %v503_v16, %v559_v24  ;;  %v458_v30 = vadd.f32 %v457_v25, %v415_v18  ;;  %689 = vmatmul.f32.vlgmr.msrb.gmra.mxu3 %v559_v24 }
  0xc2   : > { %v493_v37 = vadd.f32 %v492_v12, %v458_v30  ;;  %755 = vmatmul.f32.vlgmr.msra.gmra.mxu0 %v560_v29  ;;  %v561_v40 = vand.u32 4294901760, %v560_v29 }
  0xc4   : > { %v504_v42 = vmax.f32 %v493_v37, 0.0  ;;  %809 = vmatmul.f32.vlgmr.msra.gmra.mxu1 %v561_v40  ;;  %v562_v45 = vsub.f32 %v560_v29, %v561_v40 }
  0xc6   : > { %v496_v55 = vpop.f32.mrf.mxu1  ;;  %v567_v61 = vand.u32 4294901760, %v504_v42  ;;  %v563_v4 = vand.u32 4294901760, %v562_v45 }
  0xc7   : > { %v461_v9 = vpop.f32.mrf.mxu0 }
  0xc8   : > { %v568_v13 = vsub.f32 %v504_v42, %v567_v61  ;;  %v462_v14 = vadd.f32 %v461_v9, %v421_v56  ;;  %564 = vmatmul.f32.vlgmr.msrb.gmra.mxu2 %v563_v4  ;;  %693 = vmatmul.f32.gmra.mxu3 %v567_v61 }
  0xca   : > { %v497_v19 = vadd.f32 %v496_v55, %v462_v14  ;;  %760 = vmatmul.f32.gmra.mxu0 %v568_v13  ;;  %v569_v20 = vand.u32 4294901760, %v568_v13 }
  0xcc   : > { %v505_v22 = vmax.f32 %v497_v19, 0.0  ;;  %815 = vmatmul.f32.gmra.mxu1 %v569_v20  ;;  %v570_v26 = vsub.f32 %v568_v13, %v569_v20 }
  0xce   : > { %v575_v28 = vand.u32 4294901760, %v505_v22  ;;  %v571_v32 = vand.u32 4294901760, %v570_v26  ;;  %v500_v34 = vpop.f32.mrf.mxu1 }
  0xcf   : > { %v465_v33 = vpop.f32.mrf.mxu0 }
  0xd0   : > { %v576_v38 = vsub.f32 %v505_v22, %v575_v28  ;;  %v466_v39 = vadd.f32 %v465_v33, %v427_v27  ;;  %572 = vmatmul.f32.gmra.mxu2 %v571_v32  ;;  %697 = vmatmul.f32.gmra.mxu3 %v575_v28 }
  0xd2   : > { %v501_v49 = vadd.f32 %v500_v34, %v466_v39  ;;  %765 = vmatmul.f32.gmra.mxu0 %v576_v38  ;;  %v577_v50 = vand.u32 4294901760, %v576_v38 }
  0xd4   : > { %v506_v54 = vmax.f32 %v501_v49, 0.0  ;;  %821 = vmatmul.f32.gmra.mxu1 %v577_v50  ;;  %v578_v62 = vsub.f32 %v576_v38, %v577_v50 }
  0xd6   : > { %v583_v2 = vand.u32 4294901760, %v506_v54  ;;  %v579_v3 = vand.u32 4294901760, %v578_v62 }
  0xd8   : > { %v584_v43 = vsub.f32 %v506_v54, %v583_v2  ;;  %580 = vmatmul.f32.gmra.mxu2 %v579_v3  ;;  %701 = vmatmul.f32.gmra.mxu3 %v583_v2 }
  0xda   : > { %770 = vmatmul.f32.gmra.mxu0 %v584_v43  ;;  %v585_v46 = vand.u32 4294901760, %v584_v43 }
  0xdc   : > { %827 = vmatmul.f32.gmra.mxu1 %v585_v46  ;;  %v586_v41 = vsub.f32 %v584_v43, %v585_v46 }
  0xde   : > { %v587_v44 = vand.u32 4294901760, %v586_v41 }
  0xe0   : > { %588 = vmatmul.f32.gmra.mxu2 %v587_v44  ;;  %945 = vmatmul.f32.vlgmr.msra.gmra.mxu3 %v559_v24 }
  0xe8   : > { %896 = vmatmul.f32.vlgmr.msra.gmra.mxu2 %v559_v24  ;;  %949 = vmatmul.f32.gmra.mxu3 %v567_v61 }
  0xf0   : > { %900 = vmatmul.f32.gmra.mxu2 %v567_v61  ;;  %953 = vmatmul.f32.gmra.mxu3 %v575_v28 }
  0xf8   : > { %904 = vmatmul.f32.gmra.mxu2 %v575_v28  ;;  %957 = vmatmul.f32.gmra.mxu3 %v583_v2 }
 0x100   : > { %908 = vmatmul.f32.gmra.mxu2 %v583_v2 }
 0x13f   : > { %v756_v0 = vpop.f32.mrf.mxu0 }
 0x141   : > { %v810_v5 = vpop.f32.mrf.mxu1 }
 0x143   : > { %v690_v47 = vpop.f32.mrf.mxu3 }
 0x147   : > { %v761_v12 = vpop.f32.mrf.mxu0 }
 0x149   : > { %v816_v24 = vpop.f32.mrf.mxu1 }
 0x14b   : > { %v565_v48 = vpop.f32.mrf.mxu2  ;;  %v694_v51 = vpop.f32.mrf.mxu3 }
 0x14c   : > { %v566_v63 = vadd.f32 %v1042_v57, %v565_v48 }
 0x14e   : > { %v691_v1 = vadd.f32 %v690_v47, %v566_v63 }
 0x14f   : > { %v766_v37 = vpop.f32.mrf.mxu0 }
 0x150   : > { %v757_v10 = vadd.f32 %v756_v0, %v691_v1 }
 0x151   : > { %v822_v60 = vpop.f32.mrf.mxu1 }
 0x152   : > { %v811_v17 = vadd.f32 %v810_v5, %v757_v10 }
 0x153   : > { %v573_v52 = vpop.f32.mrf.mxu2  ;;  %v698_v53 = vpop.f32.mrf.mxu3 }
 0x154   : > { %v574_v7 = vadd.f32 %v1042_v57, %v573_v52 }
 0x156   : > { %v695_v16 = vadd.f32 %v694_v51, %v574_v7 }
 0x157   : > { %v771_v14 = vpop.f32.mrf.mxu0 }
 0x158   : > { %v762_v30 = vadd.f32 %v761_v12, %v695_v16 }
 0x159   : > { %v828_v20 = vpop.f32.mrf.mxu1 }
 0x15a   : > { %v817_v36 = vadd.f32 %v816_v24, %v762_v30 }
 0x15b   : > { %v581_v58 = vpop.f32.mrf.mxu2  ;;  %v702_v59 = vpop.f32.mrf.mxu3 }
 0x15c   : > { %v582_v25 = vadd.f32 %v1042_v57, %v581_v58 }
 0x15e   : > { %v699_v35 = vadd.f32 %v698_v53, %v582_v25 }
 0x160   : > { %v767_v56 = vadd.f32 %v766_v37, %v699_v35 }
 0x162   : > { %v823_v4 = vadd.f32 %v822_v60, %v767_v56 }
 0x163   : > { %v589_v6 = vpop.f32.mrf.mxu2  ;;  %v946_v11 = vpop.f32.mrf.mxu3 }
 0x164   : > { %v590_v45 = vadd.f32 %v1042_v57, %v589_v6 }
 0x166   : > { %v703_v61 = vadd.f32 %v702_v59, %v590_v45 }
 0x168   : > { %v772_v19 = vadd.f32 %v771_v14, %v703_v61 }
 0x16a   : > { %v829_v21 = vadd.f32 %v828_v20, %v772_v19 }
 0x16b   : > { %v897_v18 = vpop.f32.mrf.mxu2  ;;  %v950_v31 = vpop.f32.mrf.mxu3 }
 0x16c   : > { %v898_v23 = vadd.f32 %v897_v18, %v811_v17 }
 0x16e   : > { %v947_v29 = vadd.f32 %v946_v11, %v898_v23 }
 0x170   : > { %962 = vst.msk [vmem:[%s1407_s21] sm:$0xff] %vm961_vm1, %v947_v29 }
 0x173   : > { %v901_v40 = vpop.f32.mrf.mxu2  ;;  %v954_v8 = vpop.f32.mrf.mxu3 }
 0x174   : > { %v902_v42 = vadd.f32 %v901_v40, %v817_v36 }
 0x176   : > { %v951_v55 = vadd.f32 %v950_v31, %v902_v42 }
 0x178   : > { %963 = vst.msk [vmem:[%s1407_s21 + $0x8] sm:$0xff] %vm961_vm1, %v951_v55 }
 0x17b   : > { %v905_v9 = vpop.f32.mrf.mxu2  ;;  %v958_v27 = vpop.f32.mrf.mxu3 }
 0x17c   : > { %v906_v13 = vadd.f32 %v905_v9, %v823_v4 }
 0x17e   : > { %v955_v15 = vadd.f32 %v954_v8, %v906_v13 }
 0x180   : > { %964 = vst.msk [vmem:[%s1407_s21 + $0x10] sm:$0xff] %vm961_vm1, %v955_v15 }
 0x183   : > { %v909_v22 = vpop.f32.mrf.mxu2 }
 0x184   : > { %v910_v26 = vadd.f32 %v909_v22, %v829_v21 }
 0x186   : > { %v959_v28 = vadd.f32 %v958_v27, %v910_v26 }
 0x188   : > { %965 = vst.msk [vmem:[%s1407_s21 + $0x18] sm:$0xff] %vm961_vm1, %v959_v28 }
 0x189 PF: > { %s15_s18 = sadd.s32 1, %s1049_s18  }
 0x18a   : > { %p12_p4 = scmp.ge.s32.totalorder %s15_s18, 4  }
 0x18c   :  { %14 = sbr.rel (!%p12_p4) target bundleno = 1 (0x1), region = 70 }

</bundles_post_ra>
